<compile_context>
chip_gen: v7x
topology: tpu7x:2x2x1
jax: 0.10.0
libtpu: 0.0.40
codegen_flags: <defaults>
</compile_context>

<pallas_src>
import functools
import jax
import jax.numpy as jnp
from jax.experimental import pallas as pl
from jax.experimental.pallas import tpu as pltpu

LANE = 128


def _round_up(n, m):
    return ((n + m - 1) // m) * m


def _mlp_kernel(n_layers, x_ref, *refs):
    """refs = (w0, b0, w1, b1, ..., w_qout, b_qout, out_ref).

    Weights arrive pre-transposed to (in, out), zero-padded lane-dense and cast to
    bf16; biases are f32 (1, out_pad). Matmuls run on the MXU with f32 accumulation;
    bias add + tanh run in f32 on the VPU/EUP.
    """
    out_ref = refs[-1]
    param_refs = refs[:-1]

    h = x_ref[...]  # (TB, M_I) f32
    for li in range(n_layers):
        w_ref = param_refs[2 * li]
        b_ref = param_refs[2 * li + 1]
        y = (
            jnp.dot(
                h.astype(jnp.bfloat16),
                w_ref[...],  # already bf16
                preferred_element_type=jnp.float32,
            )
            + b_ref[...]
        )
        h = jnp.tanh(y) if li < n_layers - 1 else y
    out_ref[...] = h  # (TB, 128) lane-dense; real Q-value lives in column 0


def init_net_params(key, M_I, M_H):
    """Unpadded f32 params matching the PyTorch module's shapes.

    Returns a flat list [w0_T, b0, w1_T, b1, ..., wq_T, bq]; each w is already
    transposed to (in, out), each b is (1, out).
    """
    params = []
    dims = [M_I] + list(M_H) + [1]  # last layer is qout -> 1
    for li in range(len(dims) - 1):
        fan_in, fan_out = dims[li], dims[li + 1]
        key, kw, kb = jax.random.split(key, 3)
        bound = 1.0 / jnp.sqrt(jnp.float32(fan_in))  # PyTorch Linear default range
        w_t = jax.random.uniform(
            kw, (fan_in, fan_out), dtype=jnp.float32, minval=-bound, maxval=bound
        )
        b = jax.random.uniform(
            kb, (1, fan_out), dtype=jnp.float32, minval=-bound, maxval=bound
        )
        params += [w_t, b]
    return params


def prepare_params(params_f32, M_I, M_H):
    """Zero-pad every layer to lane-dense (multiples of 128 on the out/in dims of the
    hidden + output layers) and cast weights to bf16. Padded bias entries are exactly
    0 so tanh(0)=0 keeps the math identical."""
    dims = [M_I] + list(M_H) + [1]
    pdims = [M_I] + [_round_up(d, LANE) for d in dims[1:]]
    prepped = []
    for li in range(len(dims) - 1):
        w, b = params_f32[2 * li], params_f32[2 * li + 1]
        pin, pout = pdims[li], pdims[li + 1]
        w_pad = (
            jnp.zeros((pin, pout), jnp.float32)
            .at[: w.shape[0], : w.shape[1]]
            .set(w)
        )
        b_pad = jnp.zeros((1, pout), jnp.float32).at[:, : b.shape[1]].set(b)
        prepped += [w_pad.astype(jnp.bfloat16), b_pad]
    return prepped


def net_forward(x, params, M_H, tb=256):
    """x: (B, M_I) f32 -> (B, 1) f32."""
    B, M_I = x.shape
    n_layers = len(M_H) + 1
    prepped = prepare_params(params, M_I, M_H)

    # Batch tile: multiple of 8 (f32 sublanes); don't over-pad tiny batches.
    tb_eff = max(8, min(tb, _round_up(B, 8)))
    n_blocks = pl.cdiv(B, tb_eff)
    b_pad = n_blocks * tb_eff
    x_pad = jnp.zeros((b_pad, M_I), jnp.float32).at[:B].set(x)

    out_pad = _round_up(1, LANE)  # lane-dense output width (128)

    # x tiles along the batch grid; weights/biases use constant index_maps so they
    # stay resident in VMEM across all grid steps.
    in_specs = [pl.BlockSpec((tb_eff, M_I), lambda i: (i, 0))]
    for p in prepped:
        in_specs.append(pl.BlockSpec(p.shape, lambda i: (0, 0)))

    kernel = functools.partial(_mlp_kernel, n_layers)

    out_full = pl.pallas_call(
        kernel,
        out_shape=jax.ShapeDtypeStruct((b_pad, out_pad), jnp.float32),
        grid=(n_blocks,),
        in_specs=in_specs,
        out_specs=pl.BlockSpec((tb_eff, out_pad), lambda i: (i, 0)),
        compiler_params=pltpu.CompilerParams(
            dimension_semantics=("parallel",),
        ),
    )(x_pad, *prepped)

    return out_full[:B, :1]


def net_forward_ref(x, params, M_H, bf16_matmul=False):
    """Pure-JAX reference (unpadded) for correctness checking."""
    n_hidden = len(M_H)

    def mm(a, w):
        if bf16_matmul:
            return jnp.dot(
                a.astype(jnp.bfloat16),
                w.astype(jnp.bfloat16),
                preferred_element_type=jnp.float32,
            )
        return jnp.dot(a, w, preferred_element_type=jnp.float32)

    h = x
    for li in range(n_hidden):
        h = jnp.tanh(mm(h, params[2 * li]) + params[2 * li + 1])
    return mm(h, params[2 * n_hidden]) + params[2 * n_hidden + 1]


if __name__ == "__main__":
    # Pendulum-v0 style: state dim 3 + scalar action = 4 inputs, two hidden layers.
    # Batch many (state, action) evaluations per call to amortize launch overhead.
    # TODO(synk): select_action / get_parameters are host-side utilities (argmax over
    # actions, optimizer plumbing) and are intentionally not part of the kernel.
    M_I = 4
    M_H = [32, 32]
    B = 1000  # not a multiple of the tile size -> exercises pad-and-slice path

    key = jax.random.PRNGKey(0)
    key, kx = jax.random.split(key)
    x = jax.random.normal(kx, (B, M_I), dtype=jnp.float32)

    params = init_net_params(key, M_I, M_H)

    out = net_forward(x, params, M_H, tb=256)
    out = jax.block_until_ready(out)
    assert out.shape == (B, 1), out.shape

    # Tight check vs a reference that uses the same bf16 dot operands (f32 accum).
    ref_bf16 = net_forward_ref(x, params, M_H, bf16_matmul=True)
    assert jnp.allclose(out, ref_bf16, atol=1e-3, rtol=1e-3), (
        jnp.max(jnp.abs(out - ref_bf16))
    )
    # Loose check vs the pure-f32 reference (bounds the bf16 operand rounding).
    ref_f32 = net_forward_ref(x, params, M_H, bf16_matmul=False)
    assert jnp.allclose(out, ref_f32, atol=5e-2, rtol=5e-2), (
        jnp.max(jnp.abs(out - ref_f32))
    )

    print("KERNEL_OK")
</pallas_src>

<mosaic_0001>
module attributes {stable_mosaic.version = 11 : i64} {
  func.func @_mlp_kernel(%arg0: i32, %arg1: memref<256x4xf32, #tpu.memory_space<vmem>>, %arg2: memref<4x128xbf16, #tpu.memory_space<vmem>>, %arg3: memref<1x128xf32, #tpu.memory_space<vmem>>, %arg4: memref<128x128xbf16, #tpu.memory_space<vmem>>, %arg5: memref<1x128xf32, #tpu.memory_space<vmem>>, %arg6: memref<128x128xbf16, #tpu.memory_space<vmem>>, %arg7: memref<1x128xf32, #tpu.memory_space<vmem>>, %arg8: memref<256x128xf32, #tpu.memory_space<vmem>>) attributes {dimension_semantics = [#tpu.dimension_semantics<parallel>], iteration_bounds = array<i64: 4>, scalar_prefetch = 0 : i64, scratch_operands = 0 : i64, tpu.core_type = #tpu.core_type<tc>, window_params = [{transform_indices = @transform_0, window_bounds = array<i64: 256, 4>}, {pipeline_mode = #tpu.pipeline_mode<synchronous>, transform_indices = @transform_1, window_bounds = array<i64: 4, 128>}, {pipeline_mode = #tpu.pipeline_mode<synchronous>, transform_indices = @transform_2, window_bounds = array<i64: 1, 128>}, {pipeline_mode = #tpu.pipeline_mode<synchronous>, transform_indices = @transform_3, window_bounds = array<i64: 128, 128>}, {pipeline_mode = #tpu.pipeline_mode<synchronous>, transform_indices = @transform_4, window_bounds = array<i64: 1, 128>}, {pipeline_mode = #tpu.pipeline_mode<synchronous>, transform_indices = @transform_5, window_bounds = array<i64: 128, 128>}, {pipeline_mode = #tpu.pipeline_mode<synchronous>, transform_indices = @transform_6, window_bounds = array<i64: 1, 128>}, {transform_indices = @transform_7, window_bounds = array<i64: 256, 128>}]} {
    %c0 = arith.constant 0 : index
    %c0_0 = arith.constant 0 : index
    %0 = vector.load %arg1[%c0, %c0_0] : memref<256x4xf32, #tpu.memory_space<vmem>>, vector<256x4xf32>
    %1 = arith.truncf %0 : vector<256x4xf32> to vector<256x4xbf16>
    %c0_1 = arith.constant 0 : index
    %c0_2 = arith.constant 0 : index
    %2 = vector.load %arg2[%c0_1, %c0_2] : memref<4x128xbf16, #tpu.memory_space<vmem>>, vector<4x128xbf16>
    %cst = arith.constant dense<0.000000e+00> : vector<256x128xf32>
    %3 = tpu.matmul %1, %2, %cst {dimension_numbers = #tpu.dot_dimension_numbers<[1], [0], [0], [1], [0, 0, 1, 1], [], []>} : vector<256x4xbf16>, vector<4x128xbf16>, vector<256x128xf32> -> vector<256x128xf32>
    %c0_3 = arith.constant 0 : index
    %c0_4 = arith.constant 0 : index
    %4 = vector.load %arg3[%c0_3, %c0_4] : memref<1x128xf32, #tpu.memory_space<vmem>>, vector<1x128xf32>
    %5 = vector.broadcast %4 : vector<1x128xf32> to vector<256x128xf32>
    %6 = arith.addf %3, %5 : vector<256x128xf32>
    %7 = math.tanh %6 : vector<256x128xf32>
    %8 = arith.truncf %7 : vector<256x128xf32> to vector<256x128xbf16>
    %c0_5 = arith.constant 0 : index
    %c0_6 = arith.constant 0 : index
    %9 = vector.load %arg4[%c0_5, %c0_6] : memref<128x128xbf16, #tpu.memory_space<vmem>>, vector<128x128xbf16>
    %cst_7 = arith.constant dense<0.000000e+00> : vector<256x128xf32>
    %10 = tpu.matmul %8, %9, %cst_7 {dimension_numbers = #tpu.dot_dimension_numbers<[1], [0], [0], [1], [0, 0, 1, 1], [], []>} : vector<256x128xbf16>, vector<128x128xbf16>, vector<256x128xf32> -> vector<256x128xf32>
    %c0_8 = arith.constant 0 : index
    %c0_9 = arith.constant 0 : index
    %11 = vector.load %arg5[%c0_8, %c0_9] : memref<1x128xf32, #tpu.memory_space<vmem>>, vector<1x128xf32>
    %12 = vector.broadcast %11 : vector<1x128xf32> to vector<256x128xf32>
    %13 = arith.addf %10, %12 : vector<256x128xf32>
    %14 = math.tanh %13 : vector<256x128xf32>
    %15 = arith.truncf %14 : vector<256x128xf32> to vector<256x128xbf16>
    %c0_10 = arith.constant 0 : index
    %c0_11 = arith.constant 0 : index
    %16 = vector.load %arg6[%c0_10, %c0_11] : memref<128x128xbf16, #tpu.memory_space<vmem>>, vector<128x128xbf16>
    %cst_12 = arith.constant dense<0.000000e+00> : vector<256x128xf32>
    %17 = tpu.matmul %15, %16, %cst_12 {dimension_numbers = #tpu.dot_dimension_numbers<[1], [0], [0], [1], [0, 0, 1, 1], [], []>} : vector<256x128xbf16>, vector<128x128xbf16>, vector<256x128xf32> -> vector<256x128xf32>
    %c0_13 = arith.constant 0 : index
    %c0_14 = arith.constant 0 : index
    %18 = vector.load %arg7[%c0_13, %c0_14] : memref<1x128xf32, #tpu.memory_space<vmem>>, vector<1x128xf32>
    %19 = vector.broadcast %18 : vector<1x128xf32> to vector<256x128xf32>
    %20 = arith.addf %17, %19 : vector<256x128xf32>
    %c0_15 = arith.constant 0 : index
    %c0_16 = arith.constant 0 : index
    %21 = vector.load %arg8[%c0_15, %c0_16] : memref<256x128xf32, #tpu.memory_space<vmem>>, vector<256x128xf32>
    tpu.vector_store %arg8[%c0_15, %c0_16], %20 {strides = array<i32>} : memref<256x128xf32, #tpu.memory_space<vmem>>, vector<256x128xf32>,
    return
  }
  func.func @transform_0(%arg0: i32) -> (i32, i32) {
    %c0_i32 = arith.constant 0 : i32
    %c0_i32_0 = arith.constant 0 : i32
    return %arg0, %c0_i32 : i32, i32
  }
  func.func @transform_1(%arg0: i32) -> (i32, i32) {
    %c0_i32 = arith.constant 0 : i32
    %c0_i32_0 = arith.constant 0 : i32
    %c0_i32_1 = arith.constant 0 : i32
    return %c0_i32, %c0_i32_0 : i32, i32
  }
  func.func @transform_2(%arg0: i32) -> (i32, i32) {
    %c0_i32 = arith.constant 0 : i32
    %c0_i32_0 = arith.constant 0 : i32
    %c0_i32_1 = arith.constant 0 : i32
    return %c0_i32, %c0_i32_0 : i32, i32
  }
  func.func @transform_3(%arg0: i32) -> (i32, i32) {
    %c0_i32 = arith.constant 0 : i32
    %c0_i32_0 = arith.constant 0 : i32
    %c0_i32_1 = arith.constant 0 : i32
    return %c0_i32, %c0_i32_0 : i32, i32
  }
  func.func @transform_4(%arg0: i32) -> (i32, i32) {
    %c0_i32 = arith.constant 0 : i32
    %c0_i32_0 = arith.constant 0 : i32
    %c0_i32_1 = arith.constant 0 : i32
    return %c0_i32, %c0_i32_0 : i32, i32
  }
  func.func @transform_5(%arg0: i32) -> (i32, i32) {
    %c0_i32 = arith.constant 0 : i32
    %c0_i32_0 = arith.constant 0 : i32
    %c0_i32_1 = arith.constant 0 : i32
    return %c0_i32, %c0_i32_0 : i32, i32
  }
  func.func @transform_6(%arg0: i32) -> (i32, i32) {
    %c0_i32 = arith.constant 0 : i32
    %c0_i32_0 = arith.constant 0 : i32
    %c0_i32_1 = arith.constant 0 : i32
    return %c0_i32, %c0_i32_0 : i32, i32
  }
  func.func @transform_7(%arg0: i32) -> (i32, i32) {
    %c0_i32 = arith.constant 0 : i32
    %c0_i32_0 = arith.constant 0 : i32
    return %arg0, %c0_i32 : i32, i32
  }
}

</mosaic_0001>

<bundles_post_ra>
// kernel: tpu_custom_call.1
= control target key start
LH: loop header
LB: loop body
LE: loop exit
PB: predicated region body
PF: predicated region fallthrough
CT: control target
= control target key end

     0   :  { %12 = vsyncpa [#allocation3], 0  ;;  %s2129_s0 = inlined_call_operand.vmem [shape: f32[1024,4], index: 0, kind: input, shape index: {}]   ;;  %s2130_s1 = inlined_call_operand.vmem [shape: bf16[4,128], index: 1, kind: input, shape index: {}]   ;;  %s2131_s2 = inlined_call_operand.vmem [shape: f32[1,128], index: 2, kind: input, shape index: {}]   ;;  %s2132_s3 = inlined_call_operand.vmem [shape: bf16[128,128], index: 3, kind: input, shape index: {}]   ;;  %s2133_s4 = inlined_call_operand.vmem [shape: f32[1,128], index: 4, kind: input, shape index: {}]   ;;  %s2134_s5 = inlined_call_operand.vmem [shape: bf16[128,128], index: 5, kind: input, shape index: {}]   ;;  %s2135_s6 = inlined_call_operand.vmem [shape: f32[1,128], index: 6, kind: input, shape index: {}]   ;;  %s2136_s7 = inlined_call_operand.hbm [shape: f32[1024,128], index: 7, kind: output, shape index: {}]  }
   0x1   :  { %14 = vsyncpa [#allocation3 + $0x1], 0  ;;  %s1758_s24 = smov 0   ;;  %s1760_s25 = smov 0  }
   0x2   :  { %s1762_s26 = smov 0   ;;  %s1764_s27 = smov 0  }
   0x3 LB: > { %s1779_s28 = sadd.s32 4294967295, %s1713_s27   ;;  %s1219_s29 = sadd.s32 4294967294, %s1713_s27   ;;  %s1713_s27 = sphi %s1764_s27, %s2142_s27   ;;  %s1709_s26 = sphi %s1762_s26, %s2141_s26   ;;  %s1705_s25 = sphi %s1760_s25, %s2140_s25   ;;  %s1701_s24 = sphi %s1758_s24, %s2139_s24  }
   0x4   : > { %s1783_s30 = sadd.s32 1, %s1713_s27   ;;  %s179_s8 = sadd.s32 1, %s1709_s26 }
   0x5   : > { %s176_s9 = ssub.s32 %s1713_s27, %s1783_s30  ;;  %p189_p0 = scmp.ne.s32.totalorder %s1709_s26, %s1705_s25 }
   0x6   : > { %p177_p1 = scmp.eq.s32.totalorder %s176_s9, 0  ;;  %p190_p2 = scmp.eq.s32.totalorder %s1779_s28, 3 }
   0x7   : > { %p195_p3 = scmp.ne.s32.totalorder %s1705_s25, %s1701_s24  ;;  %p196_p4 = scmp.eq.s32.totalorder %s1219_s29, 3 }
   0x8   : > { %s1794_s10 = scalar_select %p177_p1, %s1709_s26, %s179_s8  }
   0x9   : > { %p1796_p5 = por %p190_p2, %p189_p0  ;;  %p1800_p6 = por %p196_p4, %p195_p3 }
   0xa   : > { %p1222_p7 = scmp.ge.s32.totalorder %s1713_s27, 1  ;;  %p241_p8 = scmp.lt.s32.totalorder %s1713_s27, 5 }
   0xc   : > { %p242_p9 = pnand %p1222_p7, %p241_p8 }
   0xd   : > { %v329_v0 = vld [vmem:[%s2130_s1] sm:$0x3] (!%p242_p9)  ;;  %vm386_vm0 = vcmask (!%p242_p9), 1041408   ;;  %s1224_s15 = sshll.u32 (!%p242_p9), %s1779_s28, 5  ;;  %vm337_vm1 = vcmask (!%p242_p9), 31744   ;;  %v1508_v24 = vld [vmem:[%s2132_s3 + $0x8] sm:$0xff] (!%p242_p9)  }
   0xe   : > { %245 = sbr.rel (%p242_p9) target bundleno = 778 (0x30a), region = 48  ;;  %v1507_v1 = vld [vmem:[%s2132_s3] sm:$0xff] (!%p242_p9)   ;;  %1464 = vmatprep.subr.msk.bf16.mxu0 (!%p242_p9), %vm386_vm0, %v329_v0  ;;  %v388_v2 = vsel (!%p242_p9), %vm386_vm0, %v329_v0, 0  ;;  %p274_p10 = scmp.lt.s32.totalorder (!%p242_p9), %s1224_s15, 127  ;;  %1465 = vmatprep.subr.msk.bf16.mxu1 (!%p242_p9), %vm386_vm0, %v329_v0  ;;  %v1509_v30 = vld [vmem:[%s2132_s3 + $0x10] sm:$0xff] (!%p242_p9)   ;;  %v1510_v38 = vld [vmem:[%s2132_s3 + $0x18] sm:$0xff] (!%p242_p9)  }
   0xf   : > { %1333 = vmatpush3.bf16.msra.mxu0 (!%p242_p9), %v388_v2  ;;  %1463 = vmatpush3.bf16.msra.mxu1 (!%p242_p9), %v388_v2  ;;  %v1511_v54 = vld [vmem:[%s2132_s3 + $0x20] sm:$0xff] (!%p242_p9)   ;;  %v1512_v55 = vld [vmem:[%s2132_s3 + $0x28] sm:$0xff] (!%p242_p9)   ;;  %v1513_v56 = vld [vmem:[%s2132_s3 + $0x30] sm:$0xff] (!%p242_p9)   ;;  %s270_s14 = sand.u32 (!%p242_p9), 1, %s1705_s25   ;;  %s1266_s19 = sshll.u32 (!%p242_p9), %s1779_s28, 12 }
  0x10   : > { %1366 = vmatprep.subr.bf16.mxu1 (!%p242_p9), %v1507_v1  ;;  %v1514_v57 = vld [vmem:[%s2132_s3 + $0x38] sm:$0xff] (!%p242_p9)   ;;  %v1515_v58 = vld [vmem:[%s2134_s5] sm:$0xff] (!%p242_p9)   ;;  %v1516_v59 = vld [vmem:[%s2134_s5 + $0x8] sm:$0xff] (!%p242_p9)   ;;  %s2078_s23 = scalar_lea.hbm (!%p242_p9), %s2136_s7, %s1266_s19  ;;  %s2088_s28 = scalar_lea.sflag (!%p242_p9), [#allocation3], %s270_s14 }
  0x11   : > { %1414 = vmatprep.subr.bf16.mxu0 (!%p242_p9), %v1515_v58  ;;  %v1517_v60 = vld [vmem:[%s2134_s5 + $0x10] sm:$0xff] (!%p242_p9)   ;;  %v1518_v61 = vld [vmem:[%s2134_s5 + $0x18] sm:$0xff] (!%p242_p9)   ;;  %v1902_v62 = vld [vmem:[%s2131_s2] ss:$0 sm:$0xff] (!%p242_p9)  ;;  %s1715_s8 = smov (!%p242_p9), [#allocation2]  }
  0x12   : > { %s1655_s9 = sshll.u32 (!%p242_p9), %s1715_s8, 4  ;;  %s1656_s9 = int_to_ptr.vmem [resolvable:$false] %s1655_s9 }
  0x13   : > { %s1657_s13 = scalar_lea.vmem (!%p242_p9), %s1656_s9, 8192 }
  0x15   : > { %s2144_s15 = smov (!%p274_p10, %s1224_s15), 127 }
  0x16   : > { %s1225_s18 = sshll.u32 %s2144_s15, 3  ;;  %s1223_s15 = sshll.u32 %s270_s14, 8 }
  0x17   : > { %s1816_s21 = scalar_lea.vmem %s2129_s0, %s1225_s18  ;;  %s2013_s18 = scalar_lea.vmem [#allocation2], %s1223_s15 }
  0x18   : > { %v281_v3 = vld [vmem:[%s1816_s21] sm:$0xff]  ;;  %v282_v4 = vld [vmem:[%s1816_s21 + $0x8] sm:$0xff]  ;;  %v283_v5 = vld [vmem:[%s1816_s21 + $0x10] sm:$0xff]  ;;  %s1157_s20 = sshll.u32 %s2013_s18, 4  ;;  %s2080_s20 = int_to_ptr.vmem [resolvable:$true] %s1157_s20 }
  0x19   : > { %v313_v6 = vpack.c.bf16 %v282_v4, %v281_v3  ;;  %v284_v7 = vld [vmem:[%s1816_s21 + $0x18] sm:$0xff]  ;;  %v285_v8 = vld [vmem:[%s1816_s21 + $0x20] sm:$0xff]  ;;  %v286_v9 = vld [vmem:[%s1816_s21 + $0x28] sm:$0xff]  ;;  %s1651_s29 = scalar_lea.vmem %s2080_s20, 4096  ;;  %p1658_p0 = scmp.lt.s32.totalorder %s2080_s20, %s1656_s9 }
  0x1a   : > { %v314_v10 = vpack.c.bf16 %v284_v7, %v283_v5  ;;  %v315_v11 = vpack.c.bf16 %v286_v9, %v285_v8  ;;  %v287_v12 = vld [vmem:[%s1816_s21 + $0x30] sm:$0xff]  ;;  %v288_v13 = vld [vmem:[%s1816_s21 + $0x38] sm:$0xff]  ;;  %v289_v14 = vld [vmem:[%s1816_s21 + $0x40] sm:$0xff]  ;;  %p1652_p11 = scmp.ne.s32.totalorder %s2080_s20, %s1651_s29  ;;  %p1659_p1 = scmp.lt.s32.totalorder %s1657_s13, %s1651_s29 }
  0x1b   : > { %1334 = vmatprep.mubr.msk.bf16.mxu0 %vm337_vm1, %v313_v6  ;;  %v290_v15 = vld [vmem:[%s1816_s21 + $0x48] sm:$0xff]  ;;  %v297_v16 = vld [vmem:[%s1816_s21 + $0x80] sm:$0xff]  ;;  %v299_v19 = vld [vmem:[%s1816_s21 + $0x90] sm:$0xff]  ;;  %v316_v25 = vpack.c.bf16 %v288_v13, %v287_v12 }
  0x1c   : > { %1335 = vmatmul.mubr.msk.bf16.vlgmr.msra.gmra.mrb[0].mxu0 %vm337_vm1, %v314_v10  ;;  %v298_v17 = vld [vmem:[%s1816_s21 + $0x88] sm:$0xff]  ;;  %v300_v20 = vld [vmem:[%s1816_s21 + $0x98] sm:$0xff]  ;;  %v301_v21 = vld [vmem:[%s1816_s21 + $0xa0] sm:$0xff]  ;;  %v317_v27 = vpack.c.bf16 %v290_v15, %v289_v14  ;;  %p1653_p12 = pnand %p1652_p11, %p1796_p5  ;;  %p1660_p2 = por %p1659_p1, %p1658_p0 }
  0x1d   : > { %1338 = vmatprep.mubr.msk.bf16.mxu0 %vm337_vm1, %v315_v11  ;;  %v321_v18 = vpack.c.bf16 %v298_v17, %v297_v16  ;;  %v322_v22 = vpack.c.bf16 %v300_v20, %v299_v19  ;;  %v302_v23 = vld [vmem:[%s1816_s21 + $0xa8] sm:$0xff]  ;;  %v303_v28 = vld [vmem:[%s1816_s21 + $0xb0] sm:$0xff]  ;;  %v304_v29 = vld [vmem:[%s1816_s21 + $0xb8] sm:$0xff]  ;;  %1415 = vmatpush3.bf16.msra.mxu0 %v1515_v58 }
  0x1e   : > { %v323_v26 = vpack.c.bf16 %v302_v23, %v301_v21  ;;  %v305_v31 = vld [vmem:[%s1816_s21 + $0xc0] sm:$0xff]  ;;  %v306_v32 = vld [vmem:[%s1816_s21 + $0xc8] sm:$0xff]  ;;  %v291_v33 = vld [vmem:[%s1816_s21 + $0x50] sm:$0xff]  ;;  %v324_v37 = vpack.c.bf16 %v304_v29, %v303_v28  ;;  %1416 = vmatprep.subr.bf16.mxu0 %v1516_v59  ;;  %p1654_p13 = pneg %p1653_p12 }
  0x1f   : > { %1350 = vmatprep.mubr.msk.bf16.mxu1 %vm337_vm1, %v321_v18  ;;  %v292_v34 = vld [vmem:[%s1816_s21 + $0x58] sm:$0xff]  ;;  %v293_v35 = vld [vmem:[%s1816_s21 + $0x60] sm:$0xff]  ;;  %v294_v36 = vld [vmem:[%s1816_s21 + $0x68] sm:$0xff]  ;;  %v325_v39 = vpack.c.bf16 %v306_v32, %v305_v31 }
  0x20   : > { %1351 = vmatmul.mubr.msk.bf16.vlgmr.msra.gmra.mrb[0].mxu1 %vm337_vm1, %v322_v22  ;;  %v318_v40 = vpack.c.bf16 %v292_v34, %v291_v33  ;;  %v319_v41 = vpack.c.bf16 %v294_v36, %v293_v35  ;;  %v307_v42 = vld [vmem:[%s1816_s21 + $0xd0] sm:$0xff]  ;;  %v308_v43 = vld [vmem:[%s1816_s21 + $0xd8] sm:$0xff]  ;;  %v309_v44 = vld [vmem:[%s1816_s21 + $0xe0] sm:$0xff]  ;;  %p1661_p3 = pnand %p1660_p2, %p1654_p13 }
  0x21   : > { %1354 = vmatprep.mubr.msk.bf16.mxu1 %vm337_vm1, %v323_v26  ;;  %1367 = vmatpush3.bf16.msra.mxu1 %v1507_v1  ;;  %v310_v45 = vld [vmem:[%s1816_s21 + $0xe8] sm:$0xff]  ;;  %v295_v46 = vld [vmem:[%s1816_s21 + $0x70] sm:$0xff]  ;;  %v296_v47 = vld [vmem:[%s1816_s21 + $0x78] sm:$0xff]  ;;  %v326_v48 = vpack.c.bf16 %v308_v43, %v307_v42 }
  0x22   : > { %1368 = vmatprep.subr.bf16.mxu1 %v1508_v24  ;;  %v327_v49 = vpack.c.bf16 %v310_v45, %v309_v44  ;;  %v320_v50 = vpack.c.bf16 %v296_v47, %v295_v46  ;;  %v311_v51 = vld [vmem:[%s1816_s21 + $0xf0] sm:$0xff]  ;;  %v312_v52 = vld [vmem:[%s1816_s21 + $0xf8] sm:$0xff]  ;;  %1417 = vmatpush3.bf16.msra.mxu0 %v1516_v59 }
  0x23   : > { %v328_v53 = vpack.c.bf16 %v312_v52, %v311_v51  ;;  %1418 = vmatprep.subr.bf16.mxu0 %v1517_v60 }
  0x24   : > { %1339 = vmatmul.mubr.msk.bf16.gmra.mrb[4].mxu0 %vm337_vm1, %v316_v25 }
  0x25   : > { %1342 = vmatprep.mubr.msk.bf16.mxu0 %vm337_vm1, %v317_v27  ;;  %1369 = vmatpush3.bf16.msra.mxu1 %v1508_v24 }
  0x26   : > { %1370 = vmatprep.subr.bf16.mxu1 %v1509_v30  ;;  %1419 = vmatpush3.bf16.msra.mxu0 %v1517_v60 }
  0x27   : > { %1420 = vmatprep.subr.bf16.mxu0 %v1518_v61 }
  0x28   : > { %1355 = vmatmul.mubr.msk.bf16.gmra.mrb[4].mxu1 %vm337_vm1, %v324_v37 }
  0x29   : > { %1358 = vmatprep.mubr.msk.bf16.mxu1 %vm337_vm1, %v325_v39  ;;  %1371 = vmatpush3.bf16.msra.mxu1 %v1509_v30 }
  0x2a   : > { %1372 = vmatprep.subr.bf16.mxu1 %v1510_v38  ;;  %1421 = vmatpush3.bf16.msra.mxu0 %v1518_v61 }
  0x2c   : > { %1343 = vmatmul.mubr.msk.bf16.gmra.mrb[8].mxu0 %vm337_vm1, %v318_v40 }
  0x2d   : > { %1346 = vmatprep.mubr.msk.bf16.mxu0 %vm337_vm1, %v319_v41  ;;  %1373 = vmatpush3.bf16.msra.mxu1 %v1510_v38 }
  0x2e   : > { %1374 = vmatprep.subr.bf16.mxu1 %v1511_v54 }
  0x30   : > { %1359 = vmatmul.mubr.msk.bf16.gmra.mrb[8].mxu1 %vm337_vm1, %v326_v48 }
  0x31   : > { %1362 = vmatprep.mubr.msk.bf16.mxu1 %vm337_vm1, %v327_v49  ;;  %1375 = vmatpush3.bf16.msra.mxu1 %v1511_v54 }
  0x32   : > { %1376 = vmatprep.subr.bf16.mxu1 %v1512_v55 }
  0x34   : > { %1347 = vmatmul.mubr.msk.bf16.gmra.mrb[12].mxu0 %vm337_vm1, %v320_v50 }
  0x35   : > { %1377 = vmatpush3.bf16.msra.mxu1 %v1512_v55 }
  0x36   : > { %1378 = vmatprep.subr.bf16.mxu1 %v1513_v56 }
  0x38   : > { %1363 = vmatmul.mubr.msk.bf16.gmra.mrb[12].mxu1 %vm337_vm1, %v328_v53 }
  0x39   : > { %1379 = vmatpush3.bf16.msra.mxu1 %v1513_v56 }
  0x3a   : > { %1380 = vmatprep.subr.bf16.mxu1 %v1514_v57 }
  0x3d   : > { %1381 = vmatpush3.bf16.msra.mxu1 %v1514_v57 }
  0xef   : > { %v1336_v63 = vpop.f32.mrb[0].mxu0 }
  0xf0   : > { %v433_v0 = vadd.f32 %v1336_v63, %v1902_v62  ;;  %v424_v1 = vpop.f32.mrb[1].mxu0 }
  0xf1   : > { %v425_v2 = vadd.f32 %v1902_v62, %v424_v1  ;;  %v1337_v3 = vpop.f32.mrb[2].mxu0 }
  0xf2   : > { %1523 = vtanh.f32 %v433_v0  ;;  %v436_v4 = vadd.f32 %v1337_v3, %v1902_v62  ;;  %v427_v5 = vpop.f32.mrb[3].mxu0 }
  0xf3   : > { %1525 = vtanh.f32 %v425_v2  ;;  %v428_v6 = vadd.f32 %v1902_v62, %v427_v5  ;;  %v1352_v7 = vpop.f32.mrb[0].mxu1 }
  0xf4   : > { %1527 = vtanh.f32 %v436_v4  ;;  %v497_v8 = vadd.f32 %v1352_v7, %v1902_v62  ;;  %v488_v9 = vpop.f32.mrb[1].mxu1 }
  0xf5   : > { %1529 = vtanh.f32 %v428_v6  ;;  %v489_v10 = vadd.f32 %v1902_v62, %v488_v9  ;;  %v1353_v11 = vpop.f32.mrb[2].mxu1 }
  0xf6   : > { %1531 = vtanh.f32 %v497_v8  ;;  %v500_v13 = vadd.f32 %v1353_v11, %v1902_v62  ;;  %v491_v14 = vpop.f32.mrb[3].mxu1 }
  0xf7   : > { %v1340_v12 = vpop.f32.mrb[4].mxu0  ;;  %1533 = vtanh.f32 %v489_v10  ;;  %v492_v21 = vadd.f32 %v1902_v62, %v491_v14 }
  0xf8   : > { %v449_v15 = vadd.f32 %v1340_v12, %v1902_v62  ;;  %v440_v16 = vpop.f32.mrb[5].mxu0  ;;  %1535 = vtanh.f32 %v500_v13 }
  0xf9   : > { %v441_v17 = vadd.f32 %v1902_v62, %v440_v16  ;;  %v1341_v18 = vpop.f32.mrb[6].mxu0 }
  0xfa   : > { %1537 = vtanh.f32 %v449_v15  ;;  %v452_v19 = vadd.f32 %v1341_v18, %v1902_v62  ;;  %v443_v20 = vpop.f32.mrb[7].mxu0 }
  0xfb   : > { %1539 = vtanh.f32 %v441_v17  ;;  %v444_v22 = vadd.f32 %v1902_v62, %v443_v20  ;;  %v1356_v24 = vpop.f32.mrb[4].mxu1 }
  0xfc   : > { %v1524_v23 = vpop.eup %1523  ;;  %1541 = vtanh.f32 %v452_v19  ;;  %v513_v26 = vadd.f32 %v1356_v24, %v1902_v62  ;;  %v504_v27 = vpop.f32.mrb[5].mxu1 }
  0xfd   : > { %v1526_v25 = vpop.eup %1525  ;;  %1543 = vtanh.f32 %v444_v22  ;;  %v505_v29 = vadd.f32 %v1902_v62, %v504_v27  ;;  %v1357_v30 = vpop.f32.mrb[6].mxu1 }
  0xfe   : > { %v1528_v28 = vpop.eup %1527  ;;  %1545 = vtanh.f32 %v492_v21  ;;  %v516_v34 = vadd.f32 %v1357_v30, %v1902_v62  ;;  %v507_v35 = vpop.f32.mrb[7].mxu1 }
  0xff   : > { %v1530_v31 = vpop.eup %1529  ;;  %v1344_v32 = vpop.f32.mrb[8].mxu0  ;;  %v584_v33 = vpack.c.bf16 %v1528_v28, %v1524_v23  ;;  %1547 = vtanh.f32 %v513_v26  ;;  %v508_v45 = vadd.f32 %v1902_v62, %v507_v35 }
 0x100   : > { %v465_v36 = vadd.f32 %v1344_v32, %v1902_v62  ;;  %v456_v37 = vpop.f32.mrb[9].mxu0  ;;  %v583_v38 = vpack.c.bf16 %v1530_v31, %v1526_v25  ;;  %1549 = vtanh.f32 %v505_v29  ;;  %v1920_v39 = vpop.eup %1531 }
 0x101   : > { %v457_v40 = vadd.f32 %v1902_v62, %v456_v37  ;;  %v1345_v41 = vpop.f32.mrb[10].mxu0  ;;  %1551 = vtanh.f32 %v516_v34  ;;  %v1923_v42 = vpop.eup %1533 }
 0x102   : > { %1553 = vtanh.f32 %v465_v36  ;;  %v468_v43 = vadd.f32 %v1345_v41, %v1902_v62  ;;  %v459_v44 = vpop.f32.mrb[11].mxu0  ;;  %1382 = vmatprep.mubr.bf16.mxu1 %v583_v38  ;;  %v1927_v46 = vpop.eup %1535 }
 0x103   : > { %1555 = vtanh.f32 %v457_v40  ;;  %v460_v47 = vadd.f32 %v1902_v62, %v459_v44  ;;  %1383 = vmatmul.mubr.bf16.vlgmr.msra.gmra.mrb[16].mxu1 %v584_v33  ;;  %v1360_v49 = vpop.f32.mrb[8].mxu1  ;;  %v592_v50 = vpack.c.bf16 %v1927_v46, %v1920_v39  ;;  %v1521_v39 = vld [vmem:[%s2134_s5 + $0x30] sm:$0xff]   ;;  %v1522_v46 = vld [vmem:[%s2134_s5 + $0x38] sm:$0xff]  }
 0x104   : > { %v1538_v48 = vpop.eup %1537  ;;  %1557 = vtanh.f32 %v468_v43  ;;  %v529_v52 = vadd.f32 %v1360_v49, %v1902_v62  ;;  %v520_v53 = vpop.f32.mrb[9].mxu1  ;;  %v1519_v49 = vld [vmem:[%s2134_s5 + $0x20] sm:$0xff]  }
 0x105   : > { %v1540_v51 = vpop.eup %1539  ;;  %1559 = vtanh.f32 %v460_v47  ;;  %v521_v55 = vadd.f32 %v1902_v62, %v520_v53  ;;  %v1361_v56 = vpop.f32.mrb[10].mxu1  ;;  %1422 = vmatprep.subr.bf16.mxu0 %v1519_v49 }
 0x106   : > { %v1542_v54 = vpop.eup %1541  ;;  %1561 = vtanh.f32 %v508_v45  ;;  %v532_v60 = vadd.f32 %v1361_v56, %v1902_v62  ;;  %v523_v61 = vpop.f32.mrb[11].mxu1  ;;  %1423 = vmatpush3.bf16.msra.mxu0 %v1519_v49 }
 0x107   : > { %v1544_v57 = vpop.eup %1543  ;;  %v1348_v58 = vpop.f32.mrb[12].mxu0  ;;  %v586_v59 = vpack.c.bf16 %v1542_v54, %v1538_v48  ;;  %1563 = vtanh.f32 %v529_v52  ;;  %v524_v10 = vadd.f32 %v1902_v62, %v523_v61 }
 0x108   : > { %v1935_v63 = vpop.eup %1545  ;;  %v481_v0 = vadd.f32 %v1348_v58, %v1902_v62  ;;  %v472_v1 = vpop.f32.mrb[13].mxu0  ;;  %v585_v2 = vpack.c.bf16 %v1544_v57, %v1540_v51  ;;  %1565 = vtanh.f32 %v521_v55  ;;  %v1520_v51 = vld [vmem:[%s2134_s5 + $0x28] sm:$0xff]  }
 0x109   : > { %v1938_v3 = vpop.eup %1547  ;;  %v473_v4 = vadd.f32 %v1902_v62, %v472_v1  ;;  %v1349_v5 = vpop.f32.mrb[14].mxu0  ;;  %1567 = vtanh.f32 %v532_v60  ;;  %v591_v6 = vpack.c.bf16 %v1935_v63, %v1923_v42  ;;  %1424 = vmatprep.subr.bf16.mxu0 %v1520_v51 }
 0x10a   : > { %v1550_v7 = vpop.eup %1549  ;;  %1569 = vtanh.f32 %v481_v0  ;;  %v484_v8 = vadd.f32 %v1349_v5, %v1902_v62  ;;  %v475_v9 = vpop.f32.mrb[15].mxu0  ;;  %1386 = vmatprep.mubr.bf16.mxu1 %v585_v2  ;;  %1425 = vmatpush3.bf16.msra.mxu0 %v1520_v51 }
 0x10b   : > { %v1552_v11 = vpop.eup %1551  ;;  %1571 = vtanh.f32 %v473_v4  ;;  %v476_v12 = vadd.f32 %v1902_v62, %v475_v9  ;;  %1387 = vmatmul.mubr.bf16.gmra.mrb[20].mxu1 %v586_v59  ;;  %v1364_v14 = vpop.f32.mrb[12].mxu1  ;;  %1426 = vmatprep.subr.bf16.mxu0 %v1521_v39 }
 0x10c   : > { %v1554_v13 = vpop.eup %1553  ;;  %1573 = vtanh.f32 %v484_v8  ;;  %v594_v15 = vpack.c.bf16 %v1552_v11, %v1938_v3  ;;  %v545_v17 = vadd.f32 %v1364_v14, %v1902_v62  ;;  %v536_v18 = vpop.f32.mrb[13].mxu1 }
 0x10d   : > { %v1556_v16 = vpop.eup %1555  ;;  %1575 = vtanh.f32 %v476_v12  ;;  %v537_v20 = vadd.f32 %v1902_v62, %v536_v18  ;;  %v1365_v21 = vpop.f32.mrb[14].mxu1 }
 0x10e   : > { %v1558_v19 = vpop.eup %1557  ;;  %1577 = vtanh.f32 %v524_v10  ;;  %v548_v24 = vadd.f32 %v1365_v21, %v1902_v62  ;;  %v539_v25 = vpop.f32.mrb[15].mxu1  ;;  %1427 = vmatpush3.bf16.msra.mxu0 %v1521_v39 }
 0x10f   : > { %v1560_v22 = vpop.eup %1559  ;;  %v588_v23 = vpack.c.bf16 %v1558_v19, %v1554_v13  ;;  %1579 = vtanh.f32 %v545_v17  ;;  %v540_v28 = vadd.f32 %v1902_v62, %v539_v25  ;;  %1428 = vmatprep.subr.bf16.mxu0 %v1522_v46 }
 0x110   : > { %v1562_v26 = vpop.eup %1561  ;;  %v587_v27 = vpack.c.bf16 %v1560_v22, %v1556_v16  ;;  %1581 = vtanh.f32 %v537_v20 }
 0x111   : > { %v1564_v29 = vpop.eup %1563  ;;  %1583 = vtanh.f32 %v548_v24  ;;  %v593_v30 = vpack.c.bf16 %v1562_v26, %v1550_v7 }
 0x112   : > { %v1566_v31 = vpop.eup %1565  ;;  %1390 = vmatprep.mubr.bf16.mxu1 %v587_v27  ;;  %1585 = vtanh.f32 %v540_v28  ;;  %1429 = vmatpush3.bf16.msra.mxu0 %v1522_v46 }
 0x113   : > { %v1568_v32 = vpop.eup %1567  ;;  %1391 = vmatmul.mubr.bf16.gmra.mrb[24].mxu1 %v588_v23 }
 0x114   : > { %v1570_v33 = vpop.eup %1569  ;;  %v596_v34 = vpack.c.bf16 %v1568_v32, %v1564_v29 }
 0x115   : > { %v1572_v35 = vpop.eup %1571 }
 0x116   : > { %v1574_v36 = vpop.eup %1573 }
 0x117   : > { %v1576_v37 = vpop.eup %1575  ;;  %v590_v38 = vpack.c.bf16 %v1574_v36, %v1570_v33 }
 0x118   : > { %v1578_v40 = vpop.eup %1577  ;;  %v589_v41 = vpack.c.bf16 %v1576_v37, %v1572_v35 }
 0x119   : > { %v1580_v42 = vpop.eup %1579  ;;  %v595_v43 = vpack.c.bf16 %v1578_v40, %v1566_v31 }
 0x11a   : > { %v1582_v44 = vpop.eup %1581  ;;  %1394 = vmatprep.mubr.bf16.mxu1 %v589_v41 }
 0x11b   : > { %v1584_v62 = vpop.eup %1583  ;;  %1395 = vmatmul.mubr.bf16.gmra.mrb[28].mxu1 %v590_v38 }
 0x11c   : > { %v1586_v45 = vpop.eup %1585  ;;  %1398 = vmatprep.mubr.bf16.mxu1 %v591_v6  ;;  %v598_v47 = vpack.c.bf16 %v1584_v62, %v1580_v42 }
 0x11d   : > { %v597_v48 = vpack.c.bf16 %v1586_v45, %v1582_v44 }
 0x123   : > { %1399 = vmatmul.mubr.bf16.gmra.mrb[32].mxu1 %v592_v50  ;;  %v1969_v50 = vld [vmem:[%s2133_s4] ss:$0 sm:$0xff] }
 0x124   : > { %1402 = vmatprep.mubr.bf16.mxu1 %v593_v30 }
 0x12b   : > { %1403 = vmatmul.mubr.bf16.gmra.mrb[36].mxu1 %v594_v15 }
 0x12c   : > { %1406 = vmatprep.mubr.bf16.mxu1 %v595_v43 }
 0x133   : > { %1407 = vmatmul.mubr.bf16.gmra.mrb[40].mxu1 %v596_v34 }
 0x134   : > { %1410 = vmatprep.mubr.bf16.mxu1 %v597_v48 }
 0x13b   : > { %1411 = vmatmul.mubr.bf16.gmra.mrb[44].mxu1 %v598_v47 }
 0x1d6   : > { %v1384_v52 = vpop.f32.mrb[16].mxu1 }
 0x1d7   : > { %v713_v53 = vadd.f32 %v1384_v52, %v1969_v50  ;;  %v704_v54 = vpop.f32.mrb[17].mxu1 }
 0x1d8   : > { %v705_v55 = vadd.f32 %v1969_v50, %v704_v54  ;;  %v1385_v56 = vpop.f32.mrb[18].mxu1 }
 0x1d9   : > { %1587 = vtanh.f32 %v713_v53  ;;  %v716_v57 = vadd.f32 %v1385_v56, %v1969_v50  ;;  %v707_v58 = vpop.f32.mrb[19].mxu1 }
 0x1da   : > { %1589 = vtanh.f32 %v705_v55  ;;  %v708_v59 = vadd.f32 %v1969_v50, %v707_v58 }
 0x1db   : > { %1591 = vtanh.f32 %v716_v57 }
 0x1dc   : > { %1593 = vtanh.f32 %v708_v59 }
 0x1de   : > { %v1388_v60 = vpop.f32.mrb[20].mxu1 }
 0x1df   : > { %v729_v61 = vadd.f32 %v1388_v60, %v1969_v50  ;;  %v720_v63 = vpop.f32.mrb[21].mxu1 }
 0x1e0   : > { %v721_v0 = vadd.f32 %v1969_v50, %v720_v63  ;;  %v1389_v1 = vpop.f32.mrb[22].mxu1 }
 0x1e1   : > { %1595 = vtanh.f32 %v729_v61  ;;  %v732_v2 = vadd.f32 %v1389_v1, %v1969_v50  ;;  %v723_v3 = vpop.f32.mrb[23].mxu1 }
 0x1e2   : > { %1597 = vtanh.f32 %v721_v0  ;;  %v724_v4 = vadd.f32 %v1969_v50, %v723_v3 }
 0x1e3   : > { %v1588_v5 = vpop.eup %1587  ;;  %1599 = vtanh.f32 %v732_v2 }
 0x1e4   : > { %v1590_v6 = vpop.eup %1589  ;;  %1601 = vtanh.f32 %v724_v4 }
 0x1e5   : > { %v1592_v7 = vpop.eup %1591 }
 0x1e6   : > { %v1594_v8 = vpop.eup %1593  ;;  %v1392_v9 = vpop.f32.mrb[24].mxu1  ;;  %v864_v10 = vpack.c.bf16 %v1592_v7, %v1588_v5 }
 0x1e7   : > { %v745_v11 = vadd.f32 %v1392_v9, %v1969_v50  ;;  %v736_v12 = vpop.f32.mrb[25].mxu1  ;;  %v863_v13 = vpack.c.bf16 %v1594_v8, %v1590_v6 }
 0x1e8   : > { %v737_v14 = vadd.f32 %v1969_v50, %v736_v12  ;;  %v1393_v15 = vpop.f32.mrb[26].mxu1 }
 0x1e9   : > { %1603 = vtanh.f32 %v745_v11  ;;  %v748_v16 = vadd.f32 %v1393_v15, %v1969_v50  ;;  %v739_v17 = vpop.f32.mrb[27].mxu1  ;;  %1430 = vmatprep.mubr.bf16.mxu0 %v863_v13 }
 0x1ea   : > { %1605 = vtanh.f32 %v737_v14  ;;  %v740_v18 = vadd.f32 %v1969_v50, %v739_v17  ;;  %1431 = vmatmul.mubr.bf16.vlgmr.msra.gmra.mrb[16].mxu0 %v864_v10 }
 0x1eb   : > { %v1596_v19 = vpop.eup %1595  ;;  %1607 = vtanh.f32 %v748_v16 }
 0x1ec   : > { %v1598_v20 = vpop.eup %1597  ;;  %1609 = vtanh.f32 %v740_v18 }
 0x1ed   : > { %v1600_v21 = vpop.eup %1599 }
 0x1ee   : > { %v1602_v22 = vpop.eup %1601  ;;  %v1396_v23 = vpop.f32.mrb[28].mxu1  ;;  %v866_v24 = vpack.c.bf16 %v1600_v21, %v1596_v19 }
 0x1ef   : > { %v761_v25 = vadd.f32 %v1396_v23, %v1969_v50  ;;  %v752_v26 = vpop.f32.mrb[29].mxu1  ;;  %v865_v27 = vpack.c.bf16 %v1602_v22, %v1598_v20 }
 0x1f0   : > { %v753_v28 = vadd.f32 %v1969_v50, %v752_v26  ;;  %v1397_v29 = vpop.f32.mrb[30].mxu1 }
 0x1f1   : > { %1611 = vtanh.f32 %v761_v25  ;;  %v764_v30 = vadd.f32 %v1397_v29, %v1969_v50  ;;  %v755_v31 = vpop.f32.mrb[31].mxu1  ;;  %1434 = vmatprep.mubr.bf16.mxu0 %v865_v27 }
 0x1f2   : > { %1613 = vtanh.f32 %v753_v28  ;;  %v756_v32 = vadd.f32 %v1969_v50, %v755_v31  ;;  %1435 = vmatmul.mubr.bf16.gmra.mrb[20].mxu0 %v866_v24 }
 0x1f3   : > { %v1604_v33 = vpop.eup %1603  ;;  %1615 = vtanh.f32 %v764_v30 }
 0x1f4   : > { %v1606_v34 = vpop.eup %1605  ;;  %1617 = vtanh.f32 %v756_v32 }
 0x1f5   : > { %v1608_v35 = vpop.eup %1607 }
 0x1f6   : > { %v1610_v36 = vpop.eup %1609  ;;  %v1400_v37 = vpop.f32.mrb[32].mxu1  ;;  %v868_v38 = vpack.c.bf16 %v1608_v35, %v1604_v33 }
 0x1f7   : > { %v777_v40 = vadd.f32 %v1400_v37, %v1969_v50  ;;  %v768_v41 = vpop.f32.mrb[33].mxu1  ;;  %v867_v42 = vpack.c.bf16 %v1610_v36, %v1606_v34 }
 0x1f8   : > { %v769_v43 = vadd.f32 %v1969_v50, %v768_v41  ;;  %v1401_v44 = vpop.f32.mrb[34].mxu1 }
 0x1f9   : > { %1619 = vtanh.f32 %v777_v40  ;;  %v780_v62 = vadd.f32 %v1401_v44, %v1969_v50  ;;  %v771_v45 = vpop.f32.mrb[35].mxu1  ;;  %1438 = vmatprep.mubr.bf16.mxu0 %v867_v42 }
 0x1fa   : > { %1621 = vtanh.f32 %v769_v43  ;;  %v772_v47 = vadd.f32 %v1969_v50, %v771_v45  ;;  %1439 = vmatmul.mubr.bf16.gmra.mrb[24].mxu0 %v868_v38 }
 0x1fb   : > { %v1612_v48 = vpop.eup %1611  ;;  %1623 = vtanh.f32 %v780_v62 }
 0x1fc   : > { %v1614_v49 = vpop.eup %1613  ;;  %1625 = vtanh.f32 %v772_v47 }
 0x1fd   : > { %v1616_v51 = vpop.eup %1615 }
 0x1fe   : > { %v1618_v39 = vpop.eup %1617  ;;  %v1404_v46 = vpop.f32.mrb[36].mxu1  ;;  %v870_v52 = vpack.c.bf16 %v1616_v51, %v1612_v48 }
 0x1ff   : > { %v793_v53 = vadd.f32 %v1404_v46, %v1969_v50  ;;  %v784_v54 = vpop.f32.mrb[37].mxu1  ;;  %v869_v55 = vpack.c.bf16 %v1618_v39, %v1614_v49 }
 0x200   : > { %v785_v56 = vadd.f32 %v1969_v50, %v784_v54  ;;  %v1405_v57 = vpop.f32.mrb[38].mxu1 }
 0x201   : > { %1627 = vtanh.f32 %v793_v53  ;;  %v796_v58 = vadd.f32 %v1405_v57, %v1969_v50  ;;  %v787_v59 = vpop.f32.mrb[39].mxu1  ;;  %1442 = vmatprep.mubr.bf16.mxu0 %v869_v55 }
 0x202   : > { %1629 = vtanh.f32 %v785_v56  ;;  %v788_v60 = vadd.f32 %v1969_v50, %v787_v59  ;;  %1443 = vmatmul.mubr.bf16.gmra.mrb[28].mxu0 %v870_v52 }
 0x203   : > { %v1620_v61 = vpop.eup %1619  ;;  %1631 = vtanh.f32 %v796_v58 }
 0x204   : > { %v1622_v63 = vpop.eup %1621  ;;  %1633 = vtanh.f32 %v788_v60 }
 0x205   : > { %v1624_v0 = vpop.eup %1623 }
 0x206   : > { %v1626_v1 = vpop.eup %1625  ;;  %v1408_v2 = vpop.f32.mrb[40].mxu1  ;;  %v872_v3 = vpack.c.bf16 %v1624_v0, %v1620_v61 }
 0x207   : > { %v809_v4 = vadd.f32 %v1408_v2, %v1969_v50  ;;  %v800_v5 = vpop.f32.mrb[41].mxu1  ;;  %v871_v6 = vpack.c.bf16 %v1626_v1, %v1622_v63 }
 0x208   : > { %v801_v7 = vadd.f32 %v1969_v50, %v800_v5  ;;  %v1409_v8 = vpop.f32.mrb[42].mxu1 }
 0x209   : > { %1635 = vtanh.f32 %v809_v4  ;;  %v812_v9 = vadd.f32 %v1409_v8, %v1969_v50  ;;  %v803_v10 = vpop.f32.mrb[43].mxu1  ;;  %1446 = vmatprep.mubr.bf16.mxu0 %v871_v6 }
 0x20a   : > { %1637 = vtanh.f32 %v801_v7  ;;  %v804_v11 = vadd.f32 %v1969_v50, %v803_v10  ;;  %1447 = vmatmul.mubr.bf16.gmra.mrb[32].mxu0 %v872_v3 }
 0x20b   : > { %v1628_v12 = vpop.eup %1627  ;;  %1639 = vtanh.f32 %v812_v9 }
 0x20c   : > { %v1630_v13 = vpop.eup %1629  ;;  %1641 = vtanh.f32 %v804_v11 }
 0x20d   : > { %v1632_v14 = vpop.eup %1631 }
 0x20e   : > { %v1634_v15 = vpop.eup %1633  ;;  %v1412_v16 = vpop.f32.mrb[44].mxu1  ;;  %v874_v17 = vpack.c.bf16 %v1632_v14, %v1628_v12 }
 0x20f   : > { %v825_v18 = vadd.f32 %v1412_v16, %v1969_v50  ;;  %v816_v19 = vpop.f32.mrb[45].mxu1  ;;  %v873_v20 = vpack.c.bf16 %v1634_v15, %v1630_v13 }
 0x210   : > { %v817_v21 = vadd.f32 %v1969_v50, %v816_v19  ;;  %v1413_v22 = vpop.f32.mrb[46].mxu1 }
 0x211   : > { %1643 = vtanh.f32 %v825_v18  ;;  %v828_v23 = vadd.f32 %v1413_v22, %v1969_v50  ;;  %v819_v24 = vpop.f32.mrb[47].mxu1  ;;  %1450 = vmatprep.mubr.bf16.mxu0 %v873_v20 }
 0x212   : > { %1645 = vtanh.f32 %v817_v21  ;;  %v820_v25 = vadd.f32 %v1969_v50, %v819_v24  ;;  %1451 = vmatmul.mubr.bf16.gmra.mrb[36].mxu0 %v874_v17  ;;  %v2009_v50 = vld [vmem:[%s2135_s6] ss:$0 sm:$0xff] }
 0x213   : > { %v1636_v26 = vpop.eup %1635  ;;  %1647 = vtanh.f32 %v828_v23 }
 0x214   : > { %v1638_v27 = vpop.eup %1637  ;;  %1649 = vtanh.f32 %v820_v25 }
 0x215   : > { %v1640_v28 = vpop.eup %1639 }
 0x216   : > { %v1642_v29 = vpop.eup %1641  ;;  %v876_v30 = vpack.c.bf16 %v1640_v28, %v1636_v26 }
 0x217   : > { %v875_v31 = vpack.c.bf16 %v1642_v29, %v1638_v27 }
 0x219   : > { %1454 = vmatprep.mubr.bf16.mxu0 %v875_v31 }
 0x21a   : > { %1455 = vmatmul.mubr.bf16.gmra.mrb[40].mxu0 %v876_v30 }
 0x21b   : > { %v1644_v32 = vpop.eup %1643 }
 0x21c   : > { %v1646_v33 = vpop.eup %1645 }
 0x21d   : > { %v1648_v34 = vpop.eup %1647 }
 0x21e   : > { %v1650_v35 = vpop.eup %1649  ;;  %v878_v36 = vpack.c.bf16 %v1648_v34, %v1644_v32 }
 0x21f   : > { %v877_v37 = vpack.c.bf16 %v1650_v35, %v1646_v33 }
 0x221   : > { %1458 = vmatprep.mubr.bf16.mxu0 %v877_v37 }
 0x222   : > { %1459 = vmatmul.mubr.bf16.gmra.mrb[44].mxu0 %v878_v36 }
 0x2bd   : > { %v1432_v38 = vpop.f32.mrb[16].mxu0 }
 0x2be   : > { %v993_v40 = vadd.f32 %v1432_v38, %v2009_v50  ;;  %v984_v41 = vpop.f32.mrb[17].mxu0 }
 0x2bf   : > { %v985_v42 = vadd.f32 %v2009_v50, %v984_v41  ;;  %v1433_v43 = vpop.f32.mrb[18].mxu0 }
 0x2c0   : > { %1113 = vst [vmem:[%s2013_s18 + $0x10] sm:$0xff] %v993_v40  ;;  %v996_v44 = vadd.f32 %v1433_v43, %v2009_v50  ;;  %v987_v62 = vpop.f32.mrb[19].mxu0 }
 0x2c1   : > { %1111 = vst [vmem:[%s2013_s18] sm:$0xff] %v985_v42  ;;  %v988_v45 = vadd.f32 %v2009_v50, %v987_v62 }
 0x2c2   : > { %1114 = vst [vmem:[%s2013_s18 + $0x18] sm:$0xff] %v996_v44 }
 0x2c3   : > { %1112 = vst [vmem:[%s2013_s18 + $0x8] sm:$0xff] %v988_v45 }
 0x2c5   : > { %v1436_v47 = vpop.f32.mrb[20].mxu0 }
 0x2c6   : > { %v1009_v48 = vadd.f32 %v1436_v47, %v2009_v50  ;;  %v1000_v49 = vpop.f32.mrb[21].mxu0 }
 0x2c7   : > { %v1001_v51 = vadd.f32 %v2009_v50, %v1000_v49  ;;  %v1437_v39 = vpop.f32.mrb[22].mxu0 }
 0x2c8   : > { %1117 = vst [vmem:[%s2013_s18 + $0x30] sm:$0xff] %v1009_v48  ;;  %v1012_v46 = vadd.f32 %v1437_v39, %v2009_v50  ;;  %v1003_v52 = vpop.f32.mrb[23].mxu0 }
 0x2c9   : > { %1115 = vst [vmem:[%s2013_s18 + $0x20] sm:$0xff] %v1001_v51  ;;  %v1004_v53 = vadd.f32 %v2009_v50, %v1003_v52 }
 0x2ca   : > { %1118 = vst [vmem:[%s2013_s18 + $0x38] sm:$0xff] %v1012_v46 }
 0x2cb   : > { %1116 = vst [vmem:[%s2013_s18 + $0x28] sm:$0xff] %v1004_v53 }
 0x2cd   : > { %v1440_v54 = vpop.f32.mrb[24].mxu0 }
 0x2ce   : > { %v1025_v55 = vadd.f32 %v1440_v54, %v2009_v50  ;;  %v1016_v56 = vpop.f32.mrb[25].mxu0 }
 0x2cf   : > { %v1017_v57 = vadd.f32 %v2009_v50, %v1016_v56  ;;  %v1441_v58 = vpop.f32.mrb[26].mxu0 }
 0x2d0   : > { %1121 = vst [vmem:[%s2013_s18 + $0x50] sm:$0xff] %v1025_v55  ;;  %v1028_v59 = vadd.f32 %v1441_v58, %v2009_v50  ;;  %v1019_v60 = vpop.f32.mrb[27].mxu0 }
 0x2d1   : > { %1119 = vst [vmem:[%s2013_s18 + $0x40] sm:$0xff] %v1017_v57  ;;  %v1020_v61 = vadd.f32 %v2009_v50, %v1019_v60 }
 0x2d2   : > { %1122 = vst [vmem:[%s2013_s18 + $0x58] sm:$0xff] %v1028_v59 }
 0x2d3   : > { %1120 = vst [vmem:[%s2013_s18 + $0x48] sm:$0xff] %v1020_v61 }
 0x2d5   : > { %v1444_v63 = vpop.f32.mrb[28].mxu0 }
 0x2d6   : > { %v1041_v0 = vadd.f32 %v1444_v63, %v2009_v50  ;;  %v1032_v1 = vpop.f32.mrb[29].mxu0 }
 0x2d7   : > { %v1033_v2 = vadd.f32 %v2009_v50, %v1032_v1  ;;  %v1445_v3 = vpop.f32.mrb[30].mxu0 }
 0x2d8   : > { %1125 = vst [vmem:[%s2013_s18 + $0x70] sm:$0xff] %v1041_v0  ;;  %v1044_v4 = vadd.f32 %v1445_v3, %v2009_v50  ;;  %v1035_v5 = vpop.f32.mrb[31].mxu0 }
 0x2d9   : > { %1123 = vst [vmem:[%s2013_s18 + $0x60] sm:$0xff] %v1033_v2  ;;  %v1036_v6 = vadd.f32 %v2009_v50, %v1035_v5 }
 0x2da   : > { %1126 = vst [vmem:[%s2013_s18 + $0x78] sm:$0xff] %v1044_v4 }
 0x2db   : > { %1124 = vst [vmem:[%s2013_s18 + $0x68] sm:$0xff] %v1036_v6 }
 0x2dd   : > { %v1448_v7 = vpop.f32.mrb[32].mxu0 }
 0x2de   : > { %v1057_v8 = vadd.f32 %v1448_v7, %v2009_v50  ;;  %v1048_v9 = vpop.f32.mrb[33].mxu0 }
 0x2df   : > { %v1049_v10 = vadd.f32 %v2009_v50, %v1048_v9  ;;  %v1449_v11 = vpop.f32.mrb[34].mxu0 }
 0x2e0   : > { %1129 = vst [vmem:[%s2013_s18 + $0x90] sm:$0xff] %v1057_v8  ;;  %v1060_v12 = vadd.f32 %v1449_v11, %v2009_v50  ;;  %v1051_v13 = vpop.f32.mrb[35].mxu0 }
 0x2e1   : > { %1127 = vst [vmem:[%s2013_s18 + $0x80] sm:$0xff] %v1049_v10  ;;  %v1052_v14 = vadd.f32 %v2009_v50, %v1051_v13 }
 0x2e2   : > { %1130 = vst [vmem:[%s2013_s18 + $0x98] sm:$0xff] %v1060_v12 }
 0x2e3   : > { %1128 = vst [vmem:[%s2013_s18 + $0x88] sm:$0xff] %v1052_v14 }
 0x2e5   : > { %v1452_v15 = vpop.f32.mrb[36].mxu0 }
 0x2e6   : > { %v1073_v16 = vadd.f32 %v1452_v15, %v2009_v50  ;;  %v1064_v17 = vpop.f32.mrb[37].mxu0 }
 0x2e7   : > { %v1065_v18 = vadd.f32 %v2009_v50, %v1064_v17  ;;  %v1453_v19 = vpop.f32.mrb[38].mxu0 }
 0x2e8   : > { %1133 = vst [vmem:[%s2013_s18 + $0xb0] sm:$0xff] %v1073_v16  ;;  %v1076_v20 = vadd.f32 %v1453_v19, %v2009_v50  ;;  %v1067_v21 = vpop.f32.mrb[39].mxu0 }
 0x2e9   : > { %1131 = vst [vmem:[%s2013_s18 + $0xa0] sm:$0xff] %v1065_v18  ;;  %v1068_v22 = vadd.f32 %v2009_v50, %v1067_v21 }
 0x2ea   : > { %1134 = vst [vmem:[%s2013_s18 + $0xb8] sm:$0xff] %v1076_v20 }
 0x2eb   : > { %1132 = vst [vmem:[%s2013_s18 + $0xa8] sm:$0xff] %v1068_v22 }
 0x2ed   : > { %v1456_v23 = vpop.f32.mrb[40].mxu0 }
 0x2ee   : > { %v1089_v24 = vadd.f32 %v1456_v23, %v2009_v50  ;;  %v1080_v25 = vpop.f32.mrb[41].mxu0 }
 0x2ef   : > { %v1081_v26 = vadd.f32 %v2009_v50, %v1080_v25  ;;  %v1457_v27 = vpop.f32.mrb[42].mxu0 }
 0x2f0   : > { %1137 = vst [vmem:[%s2013_s18 + $0xd0] sm:$0xff] %v1089_v24  ;;  %v1092_v28 = vadd.f32 %v1457_v27, %v2009_v50  ;;  %v1083_v29 = vpop.f32.mrb[43].mxu0 }
 0x2f1   : > { %1135 = vst [vmem:[%s2013_s18 + $0xc0] sm:$0xff] %v1081_v26  ;;  %v1084_v30 = vadd.f32 %v2009_v50, %v1083_v29 }
 0x2f2   : > { %1138 = vst [vmem:[%s2013_s18 + $0xd8] sm:$0xff] %v1092_v28 }
 0x2f3   : > { %1136 = vst [vmem:[%s2013_s18 + $0xc8] sm:$0xff] %v1084_v30 }
 0x2f5   : > { %v1460_v31 = vpop.f32.mrb[44].mxu0 }
 0x2f6   : > { %v1105_v32 = vadd.f32 %v1460_v31, %v2009_v50  ;;  %v1096_v33 = vpop.f32.mrb[45].mxu0 }
 0x2f7   : > { %v1097_v34 = vadd.f32 %v2009_v50, %v1096_v33  ;;  %v1461_v35 = vpop.f32.mrb[46].mxu0 }
 0x2f8   : > { %1141 = vst [vmem:[%s2013_s18 + $0xf0] sm:$0xff] %v1105_v32  ;;  %v1108_v36 = vadd.f32 %v1461_v35, %v2009_v50  ;;  %v1099_v37 = vpop.f32.mrb[47].mxu0 }
 0x2f9   : > { %1139 = vst [vmem:[%s2013_s18 + $0xe0] sm:$0xff] %v1097_v34  ;;  %v1100_v38 = vadd.f32 %v2009_v50, %v1099_v37 }
 0x2fa   : > { %1142 = vst [vmem:[%s2013_s18 + $0xf8] sm:$0xff] %v1108_v36 }
 0x2fb   : > { %1140 = vst [vmem:[%s2013_s18 + $0xe8] sm:$0xff] %v1100_v38 }
 0x2fc   : > { %1664 = shalt.err (!%p1661_p3)
}
 0x2fd   : > { %s1665_s14 = scalar_lea.hbm %s2078_s23, 4096  ;;  %s1669_s17 = scalar_lea.hbm %s2136_s7, 16384 }
 0x2fe   : > { %p1666_p4 = scmp.ne.s32.totalorder %s2078_s23, %s1665_s14  ;;  %p1670_p9 = scmp.lt.u32.totalorder %s2078_s23, %s2136_s7 }
 0x2ff   : > { %p1671_p10 = scmp.lt.u32.totalorder %s1669_s17, %s1665_s14  ;;  %p1673_p12 = scmp.lt.u32.totalorder %s1665_s14, %s2078_s23 }
 0x300   : > { %p1667_p7 = pnand %p1666_p4, %p1796_p5 }
 0x301   : > { %p1672_p11 = por %p1671_p10, %p1670_p9 }
 0x302   : > { %p1668_p8 = pneg %p1667_p7 }
 0x303   : > { %p1674_p13 = por %p1673_p12, %p1672_p11 }
 0x305   : > { %p1675_p0 = pnand %p1674_p13, %p1668_p8 }
 0x307   : > { %1678 = shalt.err (!%p1675_p0)
}
 0x308   : > { %s1716_s21 = smov 128   ;;  %s1717_s22 = smov 8  }
 0x309   : > { %1466 = dma.vmem_to_hbm [thread:$0]  (%p1796_p5), %s2080_s20, 4096, %s2078_s23, %s2088_s28, %s1716_s21, %s1716_s21, %s1717_s22  }
 0x30a PF: > { %p1472_p1 = scmp.ge.s32.totalorder %s1713_s27, 2  ;;  %s1172_s29 = sand.u32 1, %s1701_s24  }
 0x30b   : > { %s1173_s8 = scalar_lea.sflag [#allocation3], %s1172_s29 }
 0x30c   : > { %p1469_p2 = pnand %p1472_p1, %p1800_p6 }
 0x30e   : > { %1696 = dma.done.wait (!%p1469_p2), %s1173_s8, 4096  }
 0x30f   : > { %1698 = vsyncadd (!%p1469_p2), %s1173_s8, 4294963200  ;;  %p17_p3 = scmp.ge.s32.totalorder %s1783_s30, 6   ;;  %s2139_s24 = smov %s1705_s25 }
 0x310   : > { %s2140_s25 = smov %s1709_s26  ;;  %s2141_s26 = smov %s1794_s10 }
 0x311   : > { %s2142_s27 = smov %s1783_s30  ;;  %19 = sbr.rel (!%p17_p3) target bundleno = 3 (0x3), region = 83 }
 0x318   :  { %1178 = vsyncpa [#allocation3], 1 }
 0x319   :  { %1180 = vsyncpa [#allocation3 + $0x1], 1 }

</bundles_post_ra>
